<compile_context>
chip_gen: v5e
topology: v5e:2x2
jax: 0.10.0
libtpu: 0.0.40
codegen_flags: <defaults>
</compile_context>

<pallas_src>
import functools
import math

import jax
import jax.numpy as jnp
from jax import lax
from jax.experimental import pallas as pl
from jax.experimental.pallas import tpu as pltpu


def _sdpa_wo_kernel(q_ref, k_ref, v_ref, mask_ref, wo_ref, o_ref,
                    q_sc, m_sc, l_sc, ctx_sc, out_sc, *, n_rep, scale):
    # q_ref   : [1, n_rep, tS, D] bf16   queries of this KV group / query tile
    # k_ref   : [1, 1, tC, D]     bf16   cache-key tile of this group
    # v_ref   : [1, 1, tC, D]     bf16
    # mask_ref: [1, 1, tS, tC]    f32    additive mask tile (head-broadcast)
    # wo_ref  : [dim, n_rep*D]    bf16   wo columns of this group's heads
    # o_ref   : [1, tS, dim]
    # q_sc    : [R, D]     bf16   pre-scaled queries (hoisted out of c loop)
    # m_sc/l_sc : [R, 1]   f32    online-softmax running max / denom
    # ctx_sc    : [R, D]   f32    running (unnormalized) context
    # out_sc    : [tS, dim] f32   output-projection accumulator over groups
    g = pl.program_id(2)
    c = pl.program_id(3)
    n_g = pl.num_programs(2)
    n_c = pl.num_programs(3)

    R, D = ctx_sc.shape          # R = n_rep * tS
    tS = R // n_rep

    @pl.when((g == 0) & (c == 0))
    def _():                     # new (batch, query-tile): reset output accumulator
        out_sc[...] = jnp.zeros_like(out_sc)

    @pl.when(c == 0)
    def _():                     # new KV group: scale q once + reset softmax state
        q_sc[...] = (q_ref[0].reshape(R, D).astype(jnp.float32)
                     * scale).astype(q_sc.dtype)
        m_sc[...] = jnp.full_like(m_sc, -jnp.inf)
        l_sc[...] = jnp.zeros_like(l_sc)
        ctx_sc[...] = jnp.zeros_like(ctx_sc)

    # ---- one batched QK^T for all n_rep heads of this group (bf16 on MXU) ----
    k = k_ref[0, 0]                                              # [tC, D] bf16
    v = v_ref[0, 0]                                              # [tC, D] bf16
    s = lax.dot_general(q_sc[...], k, (((1,), (1,)), ((), ())),
                        preferred_element_type=jnp.float32)      # [R, tC] f32

    # Broadcast the mask over heads without materializing an n_rep-tiled copy.
    mask = mask_ref[0, 0]                                        # [tS, tC] f32
    tC = mask.shape[-1]
    s = (s.reshape(n_rep, tS, tC) + mask[None]).reshape(R, tC)

    # ---- online softmax (f32 statistics; exp kept in f32 for v5e parity) ----
    m_prev = m_sc[...]                                           # [R, 1]
    m_new = jnp.maximum(m_prev, jnp.max(s, axis=-1, keepdims=True))
    alpha = jnp.exp(m_prev - m_new)
    p = jnp.exp(s - m_new)                                       # [R, tC]
    l_sc[...] = alpha * l_sc[...] + jnp.sum(p, axis=-1, keepdims=True)
    ctx_sc[...] = alpha * ctx_sc[...] + lax.dot_general(
        p.astype(jnp.bfloat16), v, (((1,), (0,)), ((), ())),
        preferred_element_type=jnp.float32)                      # [R, D]
    m_sc[...] = m_new

    # ---- group finalize: normalize + fused wo projection (bf16 MXU, f32 acc) --
    @pl.when(c == n_c - 1)
    def _():
        l = l_sc[...]
        # guard fully-masked rows (l == 0) before the approx reciprocal
        inv_l = pl.reciprocal(jnp.where(l == 0.0, 1.0, l), approx=True)
        ctx = ctx_sc[...] * inv_l                                # [R, D] f32
        # reorder head-major rows into [tS, n_rep*D] lane-concat so the wo
        # projection contracts over all n_rep*D columns of this group at once
        ctx_grp = jnp.concatenate(
            [ctx[r * tS:(r + 1) * tS, :] for r in range(n_rep)], axis=1)
        out_sc[...] += lax.dot_general(
            ctx_grp.astype(jnp.bfloat16), wo_ref[...], (((1,), (1,)), ((), ())),
            preferred_element_type=jnp.float32)                  # [tS, dim]

    @pl.when((g == n_g - 1) & (c == n_c - 1))
    def _():
        o_ref[0] = out_sc[...].astype(o_ref.dtype)


def llama_sdpa(xq, keys, values, attn_mask, wo_weight, *,
               tile_s=None, tile_c=None):
    S, H, B, D = xq.shape
    _, G, C, _ = keys.shape
    dim = wo_weight.shape[0]
    assert dim == H * D and H % G == 0
    n_rep = H // G

    tS = tile_s if tile_s is not None else min(S, 256)
    tC = tile_c if tile_c is not None else min(C, 1024)
    # TODO(synk): masked tail tiles for ragged cache lengths / non-divisible S.
    assert S % tS == 0 and C % tC == 0

    # Layout plumbing (the permutes the PyTorch forward performs) + bf16 on
    # the wire for everything feeding the MXU (halves K/V & wo HBM traffic and
    # removes per-tile casts from the inner loop).  The mask stays f32.
    q = jnp.transpose(xq, (2, 1, 0, 3)).astype(jnp.bfloat16)       # [B, H, S, D]
    k = keys.astype(jnp.bfloat16)                                  # [B, G, C, D]
    v = values.astype(jnp.bfloat16)                                # [B, G, C, D]
    mask = jnp.transpose(attn_mask, (2, 1, 0, 3)).astype(jnp.float32)  # [B,1,S,C]
    wo = wo_weight.astype(jnp.bfloat16)                            # [dim, dim]

    out_dtype = xq.dtype
    out_bytes = jnp.dtype(out_dtype).itemsize
    R = n_rep * tS

    # VMEM budget derived from actual tile sizes (double-buffered pipeline
    # blocks + persistent scratch), capped at 64 MiB so it is valid on v7x.
    pipelined = 2 * (
        R * D * 2 +                 # q block   (bf16)
        2 * tC * D * 2 +            # k, v blocks (bf16)
        tS * tC * 4 +               # mask block (f32)
        dim * n_rep * D * 2 +       # wo block  (bf16)
        tS * dim * out_bytes)       # out block
    scratch = (R * D * 2            # q_sc  (bf16)
               + 2 * R * 4          # m, l  (f32)
               + R * D * 4          # ctx   (f32)
               + tS * dim * 4)      # out_sc (f32)
    vmem_limit = int(min(max((pipelined + scratch) * 3 // 2, 16 * 1024 * 1024),
                         64 * 1024 * 1024))

    kernel = functools.partial(_sdpa_wo_kernel, n_rep=n_rep,
                               scale=1.0 / math.sqrt(D))
    grid = (B, S // tS, G, C // tC)

    return pl.pallas_call(
        kernel,
        out_shape=jax.ShapeDtypeStruct((B, S, dim), out_dtype),
        grid=grid,
        in_specs=[
            pl.BlockSpec((1, n_rep, tS, D), lambda b, i, g, c: (b, g, i, 0)),
            pl.BlockSpec((1, 1, tC, D),     lambda b, i, g, c: (b, g, c, 0)),
            pl.BlockSpec((1, 1, tC, D),     lambda b, i, g, c: (b, g, c, 0)),
            pl.BlockSpec((1, 1, tS, tC),    lambda b, i, g, c: (b, 0, i, c)),
            pl.BlockSpec((dim, n_rep * D),  lambda b, i, g, c: (0, g)),
        ],
        out_specs=pl.BlockSpec((1, tS, dim), lambda b, i, g, c: (b, i, 0)),
        scratch_shapes=[
            pltpu.VMEM((R, D), jnp.bfloat16),      # pre-scaled q (per group)
            pltpu.VMEM((R, 1), jnp.float32),       # running max
            pltpu.VMEM((R, 1), jnp.float32),       # running denom
            pltpu.VMEM((R, D), jnp.float32),       # running context
            pltpu.VMEM((tS, dim), jnp.float32),    # wo-projection accumulator
        ],
        compiler_params=pltpu.CompilerParams(
            dimension_semantics=("parallel", "parallel", "arbitrary", "arbitrary"),
            vmem_limit_bytes=vmem_limit,
        ),
    )(q, k, v, mask, wo)


def _reference(xq, keys, values, attn_mask, wo_weight):
    # Pure-JAX (f32) transcription of the PyTorch forward, for verification.
    S, H, B, D = xq.shape
    _, G, C, _ = keys.shape
    n_rep = H // G
    q = jnp.transpose(xq, (2, 1, 0, 3))                # [B, H, S, D]
    mask = jnp.transpose(attn_mask, (2, 1, 0, 3))      # [B, 1, S, C]
    k = jnp.repeat(keys, n_rep, axis=1)                # repeat_interleave over heads
    v = jnp.repeat(values, n_rep, axis=1)
    scores = jnp.einsum('bhsd,bhcd->bhsc', q, k) / math.sqrt(D) + mask
    p = jax.nn.softmax(scores.astype(jnp.float32), axis=-1).astype(xq.dtype)
    ctx = jnp.einsum('bhsc,bhcd->bhsd', p, v)
    out = jnp.transpose(ctx, (0, 2, 1, 3)).reshape(B, S, H * D)
    return out @ wo_weight.T


if __name__ == "__main__":
    # Small shapes consistent with the module (GQA: n_heads > n_kv_heads).
    # n_rep*D = 128 keeps the per-group wo block lane-aligned.
    B, S, C = 2, 8, 32           # batch, new seqlen, cached kv length
    H, G, D = 8, 2, 32           # n_heads, n_kv_heads, head_dim
    dim = H * D                  # 256

    key = jax.random.PRNGKey(0)
    k1, k2, k3, k4 = jax.random.split(key, 4)
    xq = jax.random.normal(k1, (S, H, B, D), jnp.float32)
    keys = jax.random.normal(k2, (B, G, C, D), jnp.float32)
    values = jax.random.normal(k3, (B, G, C, D), jnp.float32)
    wo_weight = (jax.random.normal(k4, (dim, dim), jnp.float32) * 0.05)

    # Causal-style additive mask: query s may attend to cache positions <= start + s.
    start = C - S
    s_idx = jnp.arange(S)[:, None]
    c_idx = jnp.arange(C)[None, :]
    mask2d = jnp.where(c_idx <= start + s_idx, 0.0, -1e9).astype(jnp.float32)
    attn_mask = jnp.broadcast_to(mask2d[:, None, None, :], (S, 1, B, C))

    out = llama_sdpa(xq, keys, values, attn_mask, wo_weight)
    out = jax.block_until_ready(out)

    ref = _reference(xq, keys, values, attn_mask, wo_weight)
    assert out.shape == (B, S, dim)
    # QK^T / PV / wo all run in bf16 (f32 accumulation) and the softmax
    # denominator uses the approx EUP reciprocal, so tolerance is looser than
    # a pure-f32 comparison.
    assert jnp.allclose(out, ref, rtol=4e-2, atol=4e-2), "mismatch vs reference"
    print("KERNEL_OK")
</pallas_src>

<mosaic_0001>
module attributes {stable_mosaic.version = 11 : i64} {
  func.func @_sdpa_wo_kernel(%arg0: i32, %arg1: i32, %arg2: i32, %arg3: i32, %arg4: memref<1x4x8x32xbf16, #tpu.memory_space<vmem>>, %arg5: memref<1x1x32x32xbf16, #tpu.memory_space<vmem>>, %arg6: memref<1x1x32x32xbf16, #tpu.memory_space<vmem>>, %arg7: memref<1x1x8x32xf32, #tpu.memory_space<vmem>>, %arg8: memref<256x128xbf16, #tpu.memory_space<vmem>>, %arg9: memref<1x8x256xf32, #tpu.memory_space<vmem>>, %arg10: memref<32x32xbf16, #tpu.memory_space<vmem>>, %arg11: memref<32x1xf32, #tpu.memory_space<vmem>>, %arg12: memref<32x1xf32, #tpu.memory_space<vmem>>, %arg13: memref<32x32xf32, #tpu.memory_space<vmem>>, %arg14: memref<8x256xf32, #tpu.memory_space<vmem>>) attributes {dimension_semantics = [#tpu.dimension_semantics<parallel>, #tpu.dimension_semantics<parallel>, #tpu.dimension_semantics<arbitrary>, #tpu.dimension_semantics<arbitrary>], iteration_bounds = array<i64: 2, 1, 2, 1>, scalar_prefetch = 0 : i64, scratch_operands = 5 : i64, tpu.core_type = #tpu.core_type<tc>, window_params = [{transform_indices = @transform_0, window_bounds = array<i64: 1, 4, 8, 32>}, {transform_indices = @transform_1, window_bounds = array<i64: 1, 1, 32, 32>}, {transform_indices = @transform_2, window_bounds = array<i64: 1, 1, 32, 32>}, {transform_indices = @transform_3, window_bounds = array<i64: 1, 1, 8, 32>}, {transform_indices = @transform_4, window_bounds = array<i64: 256, 128>}, {transform_indices = @transform_5, window_bounds = array<i64: 1, 8, 256>}]} {
    %c0_i32 = arith.constant 0 : i32
    %0 = arith.cmpi eq, %arg2, %c0_i32 : i32
    %c0_i32_0 = arith.constant 0 : i32
    %1 = arith.cmpi eq, %arg3, %c0_i32_0 : i32
    %2 = arith.andi %0, %1 : i1
    %3 = arith.extui %2 : i1 to i32
    %c0_i32_1 = arith.constant 0 : i32
    %4 = arith.cmpi ne, %3, %c0_i32_1 : i32
    scf.if %4 {
      %cst_36 = arith.constant 0.000000e+00 : f32
      %52 = vector.broadcast %cst_36 : f32 to vector<8x256xf32>
      %c0_37 = arith.constant 0 : index
      %c0_38 = arith.constant 0 : index
      %53 = vector.load %arg14[%c0_37, %c0_38] : memref<8x256xf32, #tpu.memory_space<vmem>>, vector<8x256xf32>
      tpu.vector_store %arg14[%c0_37, %c0_38], %52 {strides = array<i32>} : memref<8x256xf32, #tpu.memory_space<vmem>>, vector<8x256xf32>,
    } else {
    }
    %c0_i32_2 = arith.constant 0 : i32
    %5 = arith.cmpi eq, %arg3, %c0_i32_2 : i32
    %6 = arith.extui %5 : i1 to i32
    %c0_i32_3 = arith.constant 0 : i32
    %7 = arith.cmpi ne, %6, %c0_i32_3 : i32
    scf.if %7 {
      %c0_36 = arith.constant 0 : index
      %c0_37 = arith.constant 0 : index
      %c0_38 = arith.constant 0 : index
      %c0_39 = arith.constant 0 : index
      %52 = vector.load %arg4[%c0_36, %c0_37, %c0_38, %c0_39] : memref<1x4x8x32xbf16, #tpu.memory_space<vmem>>, vector<1x4x8x32xbf16>
      %53 = vector.shape_cast %52 : vector<1x4x8x32xbf16> to vector<4x8x32xbf16>
      %54 = vector.shape_cast %53 : vector<4x8x32xbf16> to vector<32x32xbf16>
      %55 = arith.extf %54 : vector<32x32xbf16> to vector<32x32xf32>
      %cst_40 = arith.constant 0.176776692 : f32
      %56 = vector.broadcast %cst_40 : f32 to vector<32x32xf32>
      %57 = arith.mulf %55, %56 : vector<32x32xf32>
      %58 = arith.truncf %57 : vector<32x32xf32> to vector<32x32xbf16>
      %c0_41 = arith.constant 0 : index
      %c0_42 = arith.constant 0 : index
      %59 = vector.load %arg10[%c0_41, %c0_42] : memref<32x32xbf16, #tpu.memory_space<vmem>>, vector<32x32xbf16>
      tpu.vector_store %arg10[%c0_41, %c0_42], %58 {strides = array<i32>} : memref<32x32xbf16, #tpu.memory_space<vmem>>, vector<32x32xbf16>,
      %cst_43 = arith.constant 0xFF800000 : f32
      %60 = vector.broadcast %cst_43 : f32 to vector<32x1xf32>
      %c0_44 = arith.constant 0 : index
      %c0_45 = arith.constant 0 : index
      %61 = vector.load %arg11[%c0_44, %c0_45] : memref<32x1xf32, #tpu.memory_space<vmem>>, vector<32x1xf32>
      tpu.vector_store %arg11[%c0_44, %c0_45], %60 {strides = array<i32>} : memref<32x1xf32, #tpu.memory_space<vmem>>, vector<32x1xf32>,
      %cst_46 = arith.constant 0.000000e+00 : f32
      %62 = vector.broadcast %cst_46 : f32 to vector<32x1xf32>
      %c0_47 = arith.constant 0 : index
      %c0_48 = arith.constant 0 : index
      %63 = vector.load %arg12[%c0_47, %c0_48] : memref<32x1xf32, #tpu.memory_space<vmem>>, vector<32x1xf32>
      tpu.vector_store %arg12[%c0_47, %c0_48], %62 {strides = array<i32>} : memref<32x1xf32, #tpu.memory_space<vmem>>, vector<32x1xf32>,
      %cst_49 = arith.constant 0.000000e+00 : f32
      %64 = vector.broadcast %cst_49 : f32 to vector<32x32xf32>
      %c0_50 = arith.constant 0 : index
      %c0_51 = arith.constant 0 : index
      %65 = vector.load %arg13[%c0_50, %c0_51] : memref<32x32xf32, #tpu.memory_space<vmem>>, vector<32x32xf32>
      tpu.vector_store %arg13[%c0_50, %c0_51], %64 {strides = array<i32>} : memref<32x32xf32, #tpu.memory_space<vmem>>, vector<32x32xf32>,
    } else {
    }
    %c0 = arith.constant 0 : index
    %c0_4 = arith.constant 0 : index
    %c0_5 = arith.constant 0 : index
    %c0_6 = arith.constant 0 : index
    %8 = vector.load %arg5[%c0, %c0_4, %c0_5, %c0_6] : memref<1x1x32x32xbf16, #tpu.memory_space<vmem>>, vector<1x1x32x32xbf16>
    %9 = vector.shape_cast %8 : vector<1x1x32x32xbf16> to vector<32x32xbf16>
    %c0_7 = arith.constant 0 : index
    %c0_8 = arith.constant 0 : index
    %c0_9 = arith.constant 0 : index
    %c0_10 = arith.constant 0 : index
    %10 = vector.load %arg6[%c0_7, %c0_8, %c0_9, %c0_10] : memref<1x1x32x32xbf16, #tpu.memory_space<vmem>>, vector<1x1x32x32xbf16>
    %11 = vector.shape_cast %10 : vector<1x1x32x32xbf16> to vector<32x32xbf16>
    %c0_11 = arith.constant 0 : index
    %c0_12 = arith.constant 0 : index
    %12 = vector.load %arg10[%c0_11, %c0_12] : memref<32x32xbf16, #tpu.memory_space<vmem>>, vector<32x32xbf16>
    %cst = arith.constant dense<0.000000e+00> : vector<32x32xf32>
    %13 = tpu.matmul %12, %9, %cst {dimension_numbers = #tpu.dot_dimension_numbers<[1], [1], [0], [0], [0, 0, 1, 0], [], []>} : vector<32x32xbf16>, vector<32x32xbf16>, vector<32x32xf32> -> vector<32x32xf32>
    %c0_13 = arith.constant 0 : index
    %c0_14 = arith.constant 0 : index
    %c0_15 = arith.constant 0 : index
    %c0_16 = arith.constant 0 : index
    %14 = vector.load %arg7[%c0_13, %c0_14, %c0_15, %c0_16] : memref<1x1x8x32xf32, #tpu.memory_space<vmem>>, vector<1x1x8x32xf32>
    %15 = vector.shape_cast %14 : vector<1x1x8x32xf32> to vector<8x32xf32>
    %16 = vector.shape_cast %13 : vector<32x32xf32> to vector<4x8x32xf32>
    %17 = vector.shape_cast %15 : vector<8x32xf32> to vector<1x8x32xf32>
    %18 = vector.broadcast %17 : vector<1x8x32xf32> to vector<4x8x32xf32>
    %19 = arith.addf %16, %18 : vector<4x8x32xf32>
    %20 = vector.shape_cast %19 : vector<4x8x32xf32> to vector<32x32xf32>
    %c0_17 = arith.constant 0 : index
    %c0_18 = arith.constant 0 : index
    %21 = vector.load %arg11[%c0_17, %c0_18] : memref<32x1xf32, #tpu.memory_space<vmem>>, vector<32x1xf32>
    %cst_19 = arith.constant dense<0xFF800000> : vector<32xf32>
    %22 = vector.multi_reduction <maximumf>, %20, %cst_19 [1] : vector<32x32xf32> to vector<32xf32>
    %23 = vector.shape_cast %22 : vector<32xf32> to vector<32x1xf32>
    %24 = arith.maximumf %21, %23 : vector<32x1xf32>
    %25 = arith.subf %21, %24 : vector<32x1xf32>
    %26 = math.exp %25 : vector<32x1xf32>
    %27 = vector.broadcast %24 : vector<32x1xf32> to vector<32x32xf32>
    %28 = arith.subf %20, %27 : vector<32x32xf32>
    %29 = math.exp %28 : vector<32x32xf32>
    %c0_20 = arith.constant 0 : index
    %c0_21 = arith.constant 0 : index
    %30 = vector.load %arg12[%c0_20, %c0_21] : memref<32x1xf32, #tpu.memory_space<vmem>>, vector<32x1xf32>
    %31 = arith.mulf %26, %30 : vector<32x1xf32>
    %cst_22 = arith.constant dense<0.000000e+00> : vector<32xf32>
    %32 = vector.multi_reduction <add>, %29, %cst_22 [1] : vector<32x32xf32> to vector<32xf32>
    %33 = vector.shape_cast %32 : vector<32xf32> to vector<32x1xf32>
    %34 = arith.addf %31, %33 : vector<32x1xf32>
    %c0_23 = arith.constant 0 : index
    %c0_24 = arith.constant 0 : index
    %35 = vector.load %arg12[%c0_23, %c0_24] : memref<32x1xf32, #tpu.memory_space<vmem>>, vector<32x1xf32>
    tpu.vector_store %arg12[%c0_23, %c0_24], %34 {strides = array<i32>} : memref<32x1xf32, #tpu.memory_space<vmem>>, vector<32x1xf32>,
    %c0_25 = arith.constant 0 : index
    %c0_26 = arith.constant 0 : index
    %36 = vector.load %arg13[%c0_25, %c0_26] : memref<32x32xf32, #tpu.memory_space<vmem>>, vector<32x32xf32>
    %37 = vector.broadcast %26 : vector<32x1xf32> to vector<32x32xf32>
    %38 = arith.mulf %37, %36 : vector<32x32xf32>
    %39 = arith.truncf %29 : vector<32x32xf32> to vector<32x32xbf16>
    %cst_27 = arith.constant dense<0.000000e+00> : vector<32x32xf32>
    %40 = tpu.matmul %39, %11, %cst_27 {dimension_numbers = #tpu.dot_dimension_numbers<[1], [0], [0], [1], [0, 0, 1, 1], [], []>} : vector<32x32xbf16>, vector<32x32xbf16>, vector<32x32xf32> -> vector<32x32xf32>
    %41 = arith.addf %38, %40 : vector<32x32xf32>
    %c0_28 = arith.constant 0 : index
    %c0_29 = arith.constant 0 : index
    %42 = vector.load %arg13[%c0_28, %c0_29] : memref<32x32xf32, #tpu.memory_space<vmem>>, vector<32x32xf32>
    tpu.vector_store %arg13[%c0_28, %c0_29], %41 {strides = array<i32>} : memref<32x32xf32, #tpu.memory_space<vmem>>, vector<32x32xf32>,
    %c0_30 = arith.constant 0 : index
    %c0_31 = arith.constant 0 : index
    %43 = vector.load %arg11[%c0_30, %c0_31] : memref<32x1xf32, #tpu.memory_space<vmem>>, vector<32x1xf32>
    tpu.vector_store %arg11[%c0_30, %c0_31], %24 {strides = array<i32>} : memref<32x1xf32, #tpu.memory_space<vmem>>, vector<32x1xf32>,
    %c0_i32_32 = arith.constant 0 : i32
    %44 = arith.cmpi eq, %arg3, %c0_i32_32 : i32
    %45 = arith.extui %44 : i1 to i32
    %c0_i32_33 = arith.constant 0 : i32
    %46 = arith.cmpi ne, %45, %c0_i32_33 : i32
    scf.if %46 {
      %c0_36 = arith.constant 0 : index
      %c0_37 = arith.constant 0 : index
      %52 = vector.load %arg12[%c0_36, %c0_37] : memref<32x1xf32, #tpu.memory_space<vmem>>, vector<32x1xf32>
      %cst_38 = arith.constant 0.000000e+00 : f32
      %53 = vector.broadcast %cst_38 : f32 to vector<32x1xf32>
      %54 = arith.cmpf oeq, %52, %53 : vector<32x1xf32>
      %cst_39 = arith.constant 1.000000e+00 : f32
      %55 = vector.broadcast %cst_39 : f32 to vector<32x1xf32>
      %56 = arith.select %54, %55, %52 : vector<32x1xi1>, vector<32x1xf32>
      %57 = tpu.reciprocal %56 {approx = true} : vector<32x1xf32> -> vector<32x1xf32>
      %c0_40 = arith.constant 0 : index
      %c0_41 = arith.constant 0 : index
      %58 = vector.load %arg13[%c0_40, %c0_41] : memref<32x32xf32, #tpu.memory_space<vmem>>, vector<32x32xf32>
      %59 = vector.broadcast %57 : vector<32x1xf32> to vector<32x32xf32>
      %60 = arith.mulf %58, %59 : vector<32x32xf32>
      %61 = vector.extract_strided_slice %60 {offsets = [0, 0], sizes = [8, 32], strides = [1, 1]} : vector<32x32xf32> to vector<8x32xf32>
      %62 = vector.extract_strided_slice %60 {offsets = [8, 0], sizes = [8, 32], strides = [1, 1]} : vector<32x32xf32> to vector<8x32xf32>
      %63 = vector.extract_strided_slice %60 {offsets = [16, 0], sizes = [8, 32], strides = [1, 1]} : vector<32x32xf32> to vector<8x32xf32>
      %64 = vector.extract_strided_slice %60 {offsets = [24, 0], sizes = [8, 32], strides = [1, 1]} : vector<32x32xf32> to vector<8x32xf32>
      %65 = tpu.concatenate %61, %62, %63, %64 in 1 : vector<8x32xf32>, vector<8x32xf32>, vector<8x32xf32>, vector<8x32xf32> -> vector<8x128xf32>
      %c0_42 = arith.constant 0 : index
      %c0_43 = arith.constant 0 : index
      %66 = vector.load %arg14[%c0_42, %c0_43] : memref<8x256xf32, #tpu.memory_space<vmem>>, vector<8x256xf32>
      %67 = arith.truncf %65 : vector<8x128xf32> to vector<8x128xbf16>
      %c0_44 = arith.constant 0 : index
      %c0_45 = arith.constant 0 : index
      %68 = vector.load %arg8[%c0_44, %c0_45] : memref<256x128xbf16, #tpu.memory_space<vmem>>, vector<256x128xbf16>
      %cst_46 = arith.constant dense<0.000000e+00> : vector<8x256xf32>
      %69 = tpu.matmul %67, %68, %cst_46 {dimension_numbers = #tpu.dot_dimension_numbers<[1], [1], [0], [0], [0, 0, 1, 0], [], []>} : vector<8x128xbf16>, vector<256x128xbf16>, vector<8x256xf32> -> vector<8x256xf32>
      %70 = arith.addf %66, %69 : vector<8x256xf32>
      %c0_47 = arith.constant 0 : index
      %c0_48 = arith.constant 0 : index
      %71 = vector.load %arg14[%c0_47, %c0_48] : memref<8x256xf32, #tpu.memory_space<vmem>>, vector<8x256xf32>
      tpu.vector_store %arg14[%c0_47, %c0_48], %70 {strides = array<i32>} : memref<8x256xf32, #tpu.memory_space<vmem>>, vector<8x256xf32>,
    } else {
    }
    %c1_i32 = arith.constant 1 : i32
    %47 = arith.cmpi eq, %arg2, %c1_i32 : i32
    %c0_i32_34 = arith.constant 0 : i32
    %48 = arith.cmpi eq, %arg3, %c0_i32_34 : i32
    %49 = arith.andi %47, %48 : i1
    %50 = arith.extui %49 : i1 to i32
    %c0_i32_35 = arith.constant 0 : i32
    %51 = arith.cmpi ne, %50, %c0_i32_35 : i32
    scf.if %51 {
      %c0_36 = arith.constant 0 : index
      %c0_37 = arith.constant 0 : index
      %52 = vector.load %arg14[%c0_36, %c0_37] : memref<8x256xf32, #tpu.memory_space<vmem>>, vector<8x256xf32>
      %c0_38 = arith.constant 0 : index
      %c0_39 = arith.constant 0 : index
      %c0_40 = arith.constant 0 : index
      %53 = vector.load %arg9[%c0_38, %c0_39, %c0_40] : memref<1x8x256xf32, #tpu.memory_space<vmem>>, vector<1x8x256xf32>
      %54 = vector.shape_cast %53 : vector<1x8x256xf32> to vector<8x256xf32>
      %55 = vector.shape_cast %52 : vector<8x256xf32> to vector<1x8x256xf32>
      tpu.vector_store %arg9[%c0_38, %c0_39, %c0_40], %55 {strides = array<i32>} : memref<1x8x256xf32, #tpu.memory_space<vmem>>, vector<1x8x256xf32>,
    } else {
    }
    return
  }
  func.func @transform_0(%arg0: i32, %arg1: i32, %arg2: i32, %arg3: i32) -> (i32, i32, i32, i32) {
    %c0_i32 = arith.constant 0 : i32
    %c0_i32_0 = arith.constant 0 : i32
    return %arg0, %arg2, %arg1, %c0_i32 : i32, i32, i32, i32
  }
  func.func @transform_1(%arg0: i32, %arg1: i32, %arg2: i32, %arg3: i32) -> (i32, i32, i32, i32) {
    %c0_i32 = arith.constant 0 : i32
    %c0_i32_0 = arith.constant 0 : i32
    return %arg0, %arg2, %arg3, %c0_i32 : i32, i32, i32, i32
  }
  func.func @transform_2(%arg0: i32, %arg1: i32, %arg2: i32, %arg3: i32) -> (i32, i32, i32, i32) {
    %c0_i32 = arith.constant 0 : i32
    %c0_i32_0 = arith.constant 0 : i32
    return %arg0, %arg2, %arg3, %c0_i32 : i32, i32, i32, i32
  }
  func.func @transform_3(%arg0: i32, %arg1: i32, %arg2: i32, %arg3: i32) -> (i32, i32, i32, i32) {
    %c0_i32 = arith.constant 0 : i32
    %c0_i32_0 = arith.constant 0 : i32
    return %arg0, %c0_i32, %arg1, %arg3 : i32, i32, i32, i32
  }
  func.func @transform_4(%arg0: i32, %arg1: i32, %arg2: i32, %arg3: i32) -> (i32, i32) {
    %c0_i32 = arith.constant 0 : i32
    %c0_i32_0 = arith.constant 0 : i32
    return %c0_i32, %arg2 : i32, i32
  }
  func.func @transform_5(%arg0: i32, %arg1: i32, %arg2: i32, %arg3: i32) -> (i32, i32, i32) {
    %c0_i32 = arith.constant 0 : i32
    %c0_i32_0 = arith.constant 0 : i32
    return %arg0, %arg1, %c0_i32 : i32, i32, i32
  }
}

</mosaic_0001>

<bundles_post_ra>
// kernel: tpu_custom_call.1
= control target key start
LH: loop header
LB: loop body
LE: loop exit
PB: predicated region body
PF: predicated region fallthrough
CT: control target
= control target key end

     0   :  { %s2333_s0 = inlined_call_operand.hbm [shape: bf16[2,8,8,32], index: 0, kind: input, shape index: {}]   ;;  %s2334_s1 = inlined_call_operand.hbm [shape: bf16[2,2,32,32], index: 1, kind: input, shape index: {}]   ;;  %s2335_s2 = inlined_call_operand.hbm [shape: bf16[2,2,32,32], index: 2, kind: input, shape index: {}]   ;;  %s2336_s3 = inlined_call_operand.hbm [shape: f32[2,1,8,32], index: 3, kind: input, shape index: {}]   ;;  %s2337_s4 = inlined_call_operand.hbm [shape: bf16[256,256], index: 4, kind: input, shape index: {}]   ;;  %s2338_s5 = inlined_call_operand.hbm [shape: f32[2,8,256], index: 5, kind: output, shape index: {}]  }
   0x1   :  { %2360 = sst [smem:[#allocation35_spill]] %s2333_s0 }
   0x2   :  { %2361 = sst [smem:[#allocation36_spill]] %s2334_s1 }
   0x3   :  { %2362 = sst [smem:[#allocation37_spill]] %s2335_s2 }
   0x4   :  { %2363 = sst [smem:[#allocation38_spill]] %s2336_s3 }
   0x5   :  { %2364 = sst [smem:[#allocation39_spill]] %s2337_s4 }
   0x6   :  { %2365 = sst [smem:[#allocation40_spill]] %s2338_s5 }
   0x7   :  { %10 = vsyncpa [#allocation8], 0 }
   0x8   :  { %12 = vsyncpa [#allocation8 + $0x1], 0 }
   0x9   :  { %13 = vsyncpa [#allocation11], 0 }
   0xa   :  { %15 = vsyncpa [#allocation11 + $0x1], 0 }
   0xb   :  { %16 = vsyncpa [#allocation14], 0 }
   0xc   :  { %18 = vsyncpa [#allocation14 + $0x1], 0 }
   0xd   :  { %19 = vsyncpa [#allocation9], 0 }
   0xe   :  { %21 = vsyncpa [#allocation9 + $0x1], 0  ;;  %s1889_s18 = smov 0   ;;  %s1891_s19 = smov 0  }
   0xf   :  { %s1893_s20 = smov 0   ;;  %s1895_s21 = smov 0  }
  0x10   :  { %s1897_s22 = smov 0   ;;  %s1899_s23 = smov 0  }
  0x11   :  { %s1901_s24 = smov 0   ;;  %s1903_s25 = smov 0  }
  0x12   :  { %s1905_s26 = smov 0   ;;  %s1907_s27 = smov 0  }
  0x13   :  { %s1909_s28 = smov 0   ;;  %s1911_s29 = smov 0  }
  0x14   :  { %s1913_s30 = smov 0   ;;  %s1915_s6 = smov 0  }
  0x15 LB: > { %2366 = sst [smem:[#allocation22_spill]] %s1807_s21  ;;  %s45_s7 = sadd.s32 1, %s1839_s29  ;;  %s1847_s6 = sphi %s1915_s6, %s27_s6   ;;  %s1843_s30 = sphi %s1913_s30, %s2429_s30   ;;  %s1839_s29 = sphi %s1911_s29, %s2428_s29   ;;  %s1835_s28 = sphi %s1909_s28, %s2427_s28   ;;  %s1831_s27 = sphi %s1907_s27, %s2414_s27   ;;  %s1827_s26 = sphi %s1905_s26, %s2426_s26   ;;  %s1823_s25 = sphi %s1903_s25, %s2425_s25   ;;  %s1819_s24 = sphi %s1901_s24, %s2424_s24   ;;  %s1815_s23 = sphi %s1899_s23, %s2412_s23   ;;  %s1811_s22 = sphi %s1897_s22, %s2423_s22   ;;  %s1807_s21 = sphi %s1895_s21, %s2422_s21   ;;  %s1803_s20 = sphi %s1893_s20, %s2421_s20   ;;  %s1799_s19 = sphi %s1891_s19, %s2420_s19   ;;  %s1795_s18 = sphi %s1889_s18, %s2419_s18  }
  0x16   : > { %2367 = sst [smem:[#allocation23_spill]] %s1815_s23  ;;  %p47_p0 = scmp.ge.s32.totalorder %s45_s7, 2 }
  0x17   : > { %2368 = sst [smem:[#allocation24_spill]] %s1831_s27  ;;  %s53_s8 = sadd.s32 1, %s1843_s30 }
  0x18   : > { %2369 = sst [smem:[#allocation25_spill]] %s1835_s28  ;;  %p71_p1 = scmp.ne.s32.totalorder %s1827_s26, %s1823_s25 }
  0x19   : > { %2370 = sst [smem:[#allocation26_spill]] %s1839_s29  ;;  %p2347_p2 = scmp.eq.s32.totalorder %s1847_s6, 0 }
  0x1a   : > { %2371 = sst [smem:[#allocation27_spill]] %s1843_s30  ;;  %s2431_s7 = smov (%p47_p0, %s45_s7), 0 }
  0x1b   : > { %2372 = sst [smem:[#allocation28_spill]] %s2431_s7  ;;  %s2433_s8 = smov (!%p47_p0, %s53_s8), %s1843_s30 }
  0x1c   : > { %s1969_s9 = ssub.s32 %s1839_s29, %s2431_s7  ;;  %s64_s10 = sadd.s32 1, %s1827_s26 }
  0x1d   : > { %p55_p3 = scmp.ge.s32.totalorder %s2433_s8, 2  ;;  %p73_p4 = por %p2347_p2, %p71_p1 }
  0x1e   : > { %p77_p5 = scmp.ne.s32.totalorder %s1823_s25, %s1819_s24  ;;  %p2346_p6 = scmp.lt.s32.totalorder %s1847_s6, 4 }
  0x1f   : > { %s2435_s8 = smov (%p55_p3, %s2433_s8), 0  ;;  %s2341_s11 = sand.u32 1, %s1827_s26  }
  0x20   : > { %2373 = sst [smem:[#allocation29_spill]] %s2435_s8  ;;  %s1982_s12 = ssub.s32 %s1843_s30, %s2435_s8 }
  0x21   : > { %s1986_s13 = sshll.u32 %s2341_s11, 4  ;;  %s59_s14 = sor.u32 %s1969_s9, %s1982_s12 }
  0x22   : > { %s1201_s15 = sshll.u32 %s1839_s29, 2  ;;  %p62_p7 = scmp.eq.s32.totalorder %s59_s14, 0 }
  0x23   : > { %s2344_s16 = sshll.u32 %s1843_s30, 3  ;;  %p1996_p8 = pnand %p2346_p6, %p73_p4 }
  0x24   : > { %s255_s17 = sadd.s32 %s2344_s16, %s1201_s15  ;;  %s2345_s5 = sand.u32 1, %s1847_s6  }
  0x25   : > { %s2001_s8 = scalar_select %p62_p7, %s1827_s26, %s64_s10  }
  0x26   : > { %s2003_s11 = sshll.u32 %s255_s17, 2  ;;  %s2376_s1 = sld [smem:[#allocation36_spill]] }
  0x27   : > { %2375 = sst [smem:[#allocation30_spill]] %s2001_s8  ;;  %s274_s27 = scalar_lea.vmem [#allocation10], %s1986_s13 }
  0x28   : > { %s286_s2 = sshll.u32 %s274_s27, 4  ;;  %s2013_s10 = scalar_lea.sflag [#allocation11], %s2345_s5  ;;  %s287_s2 = int_to_ptr.vmem [resolvable:$true] %s286_s2 }
  0x29   : > { %s2348_s17 = smov 64   ;;  %s2350_s29 = smov 4  }
  0x2a   : > { %s2377_s4 = sld [smem:[#allocation39_spill]]  ;;  %p1216_p9 = scmp.ge.s32.totalorder %s1847_s6, 1 }
  0x2b   : > { %p362_p11 = scmp.lt.s32.totalorder %s1847_s6, 5  ;;  %s2035_s8 = sadd.s32 4294967295, %s1847_s6  }
  0x2c   : > { %s283_s28 = scalar_lea.hbm %s2376_s1, %s2003_s11  ;;  %p78_p13 = scmp.eq.s32.totalorder %s2035_s8, 0 }
  0x2d   : > { %s284_s16 = sshll.u32 %s283_s28, 4  ;;  %p2030_p12 = pnand %p1216_p9, %p362_p11  ;;  %s285_s16 = int_to_ptr.hbm [resolvable:$true] %s284_s16 }
  0x2e   : > { %1374 = dma.hbm_to_vmem [thread:$0]  (!%p1996_p8), %s285_s16, 256, %s287_s2, %s2013_s10, %s2348_s17, %s2348_s17, %s2350_s29  }
  0x2f   : > { %s1197_s2 = sadd.s32 4294967294, %s1847_s6   ;;  %p152_p0 = scmp.eq.s32.totalorder %s1982_s12, 0 }
  0x30   : > { %s2024_s14 = scalar_lea.hbm %s2377_s4, %s1201_s15  ;;  %s154_s15 = sadd.s32 1, %s1815_s23 }
  0x31   : > { %p161_p1 = scmp.ne.s32.totalorder %s1815_s23, %s1811_s22  ;;  %p2046_p3 = por %p78_p13, %p77_p5 }
  0x32   : > { %p167_p4 = scmp.ne.s32.totalorder %s1811_s22, %s1807_s21  ;;  %p193_p11 = scmp.ne.s32.totalorder %s1799_s19, %s1795_s18 }
  0x33   : > { %s2053_s27 = scalar_select %p152_p0, %s1815_s23, %s154_s15  }
  0x34   : > { %p2057_p7 = por %p161_p1, %p2347_p2  ;;  %p2061_p9 = por %p167_p4, %p78_p13 }
  0x35   : > { %2380 = sst [smem:[#allocation31_spill]] %s2053_s27  ;;  %p219_p5 = scmp.eq.s32.totalorder %s2035_s8, 3 }
  0x36   : > { %s2382_s12 = scalar_select %p2061_p9, 1, 0 }
  0x37   : > { %p225_p10 = scmp.eq.s32.totalorder %s1197_s2, 3  ;;  %p2068_p6 = por %p193_p11, %p78_p13 }
  0x38   : > { %2383 = sst [smem:[#allocation32_spill]] %s2382_s12  ;;  %p2072_p0 = por %p219_p5, %p161_p1 }
  0x39   : > { %s2384_s24 = scalar_select %p2068_p6, 1, 0 }
  0x3a   : > { %p2076_p2 = por %p225_p10, %p167_p4  ;;  %s324_s17 = sand.u32 1, %s1815_s23  }
  0x3b   : > { %2385 = sst [smem:[#allocation33_spill]] %s2384_s24  ;;  %s1212_s29 = sshll.u32 %s324_s17, 3 }
  0x3c   : > { %s2387_s5 = scalar_select %p2076_p2, 1, 0 }
  0x3d   : > { %s2389_s4 = sshll.u32 %s1843_s30, 3  ;;  %s2390_s3 = sld [smem:[#allocation38_spill]] }
  0x3e   : > { %2388 = sst [smem:[#allocation34_spill]] %s2387_s5  ;;  %s326_s24 = scalar_lea.vmem [#allocation13], %s1212_s29 }
  0x3f   : > { %s336_s12 = sshll.u32 %s326_s24, 4  ;;  %p2391_p10 = scmp.lt.s32.totalorder %s1847_s6, 4  ;;  %s337_s12 = int_to_ptr.vmem [resolvable:$true] %s336_s12 }
  0x40   : > { %s2392_s5 = sand.u32 1, %s1847_s6   ;;  %s2393_s0 = sld [smem:[#allocation35_spill]] }
  0x41   : > { %p1378_p13 = pnand %p2391_p10, %p2057_p7  ;;  %s2092_s23 = scalar_lea.sflag [#allocation14], %s2392_s5 }
  0x42   : > { %s249_s24 = scalar_lea.vmem [#allocation7], %s1986_s13  ;;  %s2394_s5 = sand.u32 1, %s1827_s26  }
  0x43   : > { %s332_s2 = scalar_lea.hbm %s2390_s3, %s2389_s4  ;;  %s260_s28 = sshll.u32 %s249_s24, 4  ;;  %s261_s28 = int_to_ptr.vmem [resolvable:$true] %s260_s28 }
  0x44   : > { %s334_s21 = sshll.u32 %s332_s2, 4  ;;  %s246_s18 = scalar_lea.sflag [#allocation8], %s2394_s5  ;;  %s335_s21 = int_to_ptr.hbm [resolvable:$true] %s334_s21 }
  0x45   : > { %1380 = dma.hbm_to_vmem [thread:$0]  (!%p1378_p13), %s335_s21, 128, %s337_s12, %s2092_s23  }
  0x46   : > { %s257_s27 = scalar_lea.hbm %s2393_s0, %s2003_s11  ;;  %s2395_s21 = smov 4  }
  0x47   : > { %s258_s29 = sshll.u32 %s257_s27, 4  ;;  %s2396_s12 = smov 64   ;;  %s259_s29 = int_to_ptr.hbm [resolvable:$true] %s258_s29 }
  0x48   : > { %1371 = dma.hbm_to_vmem [thread:$0]  (!%p1996_p8), %s259_s29, 256, %s261_s28, %s246_s18, %s2396_s12, %s2396_s12, %s2395_s21  }
  0x49   : > { %s2397_s4 = sld [smem:[#allocation37_spill]]  ;;  %s300_s3 = scalar_lea.vmem [#allocation12], %s1986_s13 }
  0x4a   : > { %s312_s30 = sshll.u32 %s300_s3, 4  ;;  %s2398_s24 = sshll.u32 %s2024_s14, 4  ;;  %s313_s30 = int_to_ptr.vmem [resolvable:$true] %s312_s30  ;;  %s353_s24 = int_to_ptr.hbm [resolvable:$true] %s2398_s24 }
  0x4b   : > { %s180_s5 = sadd.s32 1, %s1803_s20  ;;  %p187_p1 = scmp.ne.s32.totalorder %s1803_s20, %s1799_s19 }
  0x4c   : > { %p2399_p4 = scmp.eq.s32.totalorder %s1969_s9, 0  ;;  %p2400_p7 = scmp.eq.s32.totalorder %s1847_s6, 0 }
  0x4d   : > { %p2401_p5 = pmov %p2391_p10  ;;  %s1851_s7 = smov 128  }
  0x4e   : > { %s2126_s29 = scalar_select %p2399_p4, %s1803_s20, %s180_s5  }
  0x4f   : > { %s309_s27 = scalar_lea.hbm %s2397_s4, %s2003_s11  ;;  %p189_p11 = por %p187_p1, %p2400_p7 }
  0x50   : > { %s310_s0 = sshll.u32 %s309_s27, 4  ;;  %s345_s11 = sand.u32 1, %s1803_s20   ;;  %s311_s0 = int_to_ptr.hbm [resolvable:$true] %s310_s0 }
  0x51   : > { %1377 = dma.hbm_to_vmem [thread:$0]  (!%p1996_p8), %s311_s0, 256, %s313_s30, %s2013_s10, %s2396_s12, %s2396_s12, %s2395_s21  }
  0x52   : > { %s1214_s13 = sshll.u32 %s345_s11, 7  ;;  %p1381_p10 = pnand %p2401_p5, %p189_p11 }
  0x53   : > { %s347_s3 = scalar_lea.vmem [#allocation15], %s1214_s13  ;;  %366 = sbr.rel (%p2030_p12) target bundleno = 1056 (0x420), region = 40 }
  0x54   : > { %s354_s28 = sshll.u32 %s347_s3, 4  ;;  %s368_s0 = sand.u32 (!%p2030_p12), 1, %s1823_s25   ;;  %s355_s28 = int_to_ptr.vmem [resolvable:$true] %s354_s28 }
  0x55   : > { %1383 = dma.hbm_to_vmem [thread:$0]  (!%p1381_p10), %s353_s24, 2048, %s355_s28, %s2092_s23, %s1851_s7, %s2396_s12, %s2395_s21  }
  0x56   : > { %s2139_s30 = sshll.u32 (!%p2030_p12), %s368_s0, 4  ;;  %s369_s9 = scalar_lea.sflag (!%p2030_p12), [#allocation8], %s368_s0 }
  0x57   : > { %s372_s10 = scalar_lea.vmem (!%p2030_p12), [#allocation7], %s2139_s30 }
  0x58   : > { %1774 = dma.done.wait (%p2046_p3), %s369_s9, 256  }
  0x59   : > { %1776 = vsyncadd (%p2046_p3), %s369_s9, 4294967040  ;;  %s378_s23 = sand.u32 1, %s2035_s8   ;;  %s382_s1 = scalar_lea.vmem [#allocation10], %s2139_s30 }
  0x5a   : > { %s379_s14 = scalar_lea.sflag [#allocation11], %s378_s23 }
  0x5b   : > { %1778 = dma.done.wait (%p2046_p3), %s379_s14, 512  }
  0x5c   : > { %1780 = vsyncadd (%p2046_p3), %s379_s14, 4294966784  ;;  %s2153_s21 = sand.u32 1, %s1811_s22   ;;  %s392_s2 = scalar_lea.vmem [#allocation12], %s2139_s30 }
  0x5d   : > { %s1220_s12 = sshll.u32 %s2153_s21, 3  ;;  %s399_s17 = scalar_lea.sflag [#allocation14], %s378_s23 }
  0x5e   : > { %s2157_s4 = scalar_lea.vmem [#allocation13], %s1220_s12 }
  0x5f   : > { %1782 = dma.done.wait (%p2061_p9), %s399_s17, 128  }
  0x60   : > { %1784 = vsyncadd (%p2061_p9), %s399_s17, 4294967168  ;;  %s410_s16 = sand.u32 1, %s1799_s19  }
  0x61   : > { %s1221_s27 = sshll.u32 %s410_s16, 7 }
  0x62   : > { %s2164_s24 = scalar_lea.vmem [#allocation15], %s1221_s27 }
  0x63   : > { %1786 = dma.done.wait (%p2068_p6), %s399_s17, 2048  }
  0x64   : > { %1788 = vsyncadd (%p2068_p6), %s399_s17, 4294965248  ;;  %s2404_s5 = sld [smem:[#allocation24_spill]]  ;;  %s1222_s11 = sshll.u32 %s2153_s21, 4 }
  0x65   : > { %s2172_s13 = scalar_lea.vmem [#allocation16], %s1222_s11 }
  0x6a   : > { %p464_p8 = scmp.eq.s32.totalorder %s2404_s5, 0 }
  0x6b   : > { %v1852_v0 = vmov (%p464_p8), 0.0  }
  0x6c   : > { %469 = sbr.rel (!%p464_p8) target bundleno = 113 (0x71), region = 64  ;;  %470 = vst [vmem:[#allocation6] sm:$0xff] (%p464_p8), %v1852_v0 }
  0x6d   : > { %471 = vst [vmem:[#allocation6 + $0x8] sm:$0xff] (%p464_p8), %v1852_v0 }
  0x71 PF: > { %vm505_vm0 = vcmask 261120   ;;  %v1324_v1 = vld [vmem:[%s382_s1 + $0x8] sm:$0xff]  ;;  %v1348_v2 = vld [vmem:[%s372_s10] sm:$0xff]   ;;  %vm491_vm1 = vcmask 257024   ;;  %vm496_vm2 = vcmask 7168   ;;  %v1853_v21 = vmov -inf  }
  0x72   : > { %v1349_v3 = vunpack.c.l.bf16 %v1348_v2  ;;  %v1350_v4 = vunpack.c.h.bf16 %v1348_v2  ;;  %v1355_v5 = vld [vmem:[%s372_s10 + $0x8] sm:$0xff]   ;;  %v553_v6 = vsel %vm505_vm0, %v1324_v1, 0  ;;  %v1323_v11 = vld [vmem:[%s382_s1] sm:$0xff]  ;;  %497 = vst.msk [vmem:[#allocation3] sm:$0xff] %vm496_vm2, %v1853_v21  ;;  %v1854_v35 = vmov 0   ;;  %s1856_s3 = smov 32  }
  0x73   : > { %v1353_v7 = vunpack.c.l.bf16 %v1355_v5  ;;  %v1354_v8 = vunpack.c.h.bf16 %v1355_v5  ;;  %561 = vmatpush.bf16.xpose.msra.mxu0 %v553_v6  ;;  %v550_v18 = vsel %vm505_vm0, %v1323_v11, 0  ;;  %v574_v22 = vld [vmem:[%s2157_s4] sm:$0xff]  ;;  %498 = vst.msk [vmem:[#allocation3 + $0x8] sm:$0xff] %vm496_vm2, %v1853_v21  ;;  %1512 = vset.pattern.permute.xlu2 %v1854_v35  ;;  %v1855_v36 = vmov 0.0   ;;  %v1326_v53 = vld [vmem:[%s392_s2 + $0x8] sm:$0xff]  ;;  %s1857_s28 = smov 96  }
  0x74   : > { %v483_v9 = vmul.f32 0.17677669, %v1349_v3  ;;  %v484_v10 = vmul.f32 0.17677669, %v1350_v4  ;;  %499 = vst.msk [vmem:[#allocation3 + $0x10] sm:$0xff] %vm496_vm2, %v1853_v21  ;;  %1513 = vset.pattern.permute.xlu0 %v1854_v35  ;;  %1514 = vset.pattern.permute.xlu1 %v1854_v35  ;;  %v1325_v54 = vld [vmem:[%s392_s2] sm:$0xff] }
  0x75   : > { %v485_v12 = vmul.f32 0.17677669, %v1353_v7  ;;  %v486_v13 = vmul.f32 0.17677669, %v1354_v8  ;;  %500 = vst.msk [vmem:[#allocation3 + $0x18] sm:$0xff] %vm496_vm2, %v1853_v21  ;;  %726 = vmatpush.bf16.msra.mxu1 %v1326_v53  ;;  %s1858_s7 = smov 64  }
  0x76   : > { %v487_v14 = vpack.c.bf16 %v483_v9, %v483_v9  ;;  %v488_v15 = vpack.c.bf16 %v484_v10, %v484_v10  ;;  %502 = vst.msk [vmem:[#allocation4 + $0x8] sm:$0xff] %vm496_vm2, %v1855_v36  ;;  %s2405_s0 = sld [smem:[#allocation24_spill]]  ;;  %vm811_vm7 = vcmask 523264   ;;  %vm813_vm8 = vcmask 785408  }
  0x77   : > { %v489_v16 = vpack.c.bf16 %v485_v12, %v485_v12  ;;  %v490_v17 = vpack.c.bf16 %v486_v13, %v486_v13  ;;  %501 = vst.msk [vmem:[#allocation4] sm:$0xff] %vm496_vm2, %v1855_v36 }
  0x78   : > { %492 = vst.msk [vmem:[#allocation2] sm:$0xf] %vm491_vm1, %v487_v14 }
  0x79   : > { %493 = vst.msk [vmem:[#allocation2 + $0x4] sm:$0xf] %vm491_vm1, %v488_v15  ;;  %v2209_v37 = vld [vmem:[#allocation3] sm:$0xff]  ;;  %727 = vmatpush.bf16.msra.mxu1 %v1325_v54 }
  0x7a   : > { %494 = vst.msk [vmem:[#allocation2 + $0x8] sm:$0xf] %vm491_vm1, %v489_v16  ;;  %v580_v41 = vld [vmem:[#allocation3 + $0x8] sm:$0xff] }
  0x7b   : > { %495 = vst.msk [vmem:[#allocation2 + $0xc] sm:$0xf] %vm491_vm1, %v490_v17  ;;  %562 = vmatpush.bf16.xpose.msra.mxu0 %v550_v18  ;;  %v581_v45 = vld [vmem:[#allocation3 + $0x10] sm:$0xff] }
  0x7c   : > { %503 = vst.msk [vmem:[#allocation4 + $0x10] sm:$0xff] %vm496_vm2, %v1855_v36  ;;  %v582_v49 = vld [vmem:[#allocation3 + $0x18] sm:$0xff]  ;;  %p976_p6 = scmp.eq.s32.totalorder %s2405_s0, 1 }
  0x7d   : > { %504 = vst.msk [vmem:[#allocation4 + $0x18] sm:$0xff] %vm496_vm2, %v1855_v36  ;;  %v644_v21 = vld [vmem:[#allocation4 + $0x8] sm:$0xff] }
  0x7e   : > { %506 = vst.msk [vmem:[#allocation5] sm:$0xff] %vm505_vm0, %v1855_v36 }
  0x7f   : > { %507 = vst.msk [vmem:[#allocation5 + $0x8] sm:$0xff] %vm505_vm0, %v1855_v36 }
  0x80   : > { %v1327_v19 = vld [vmem:[#allocation2] sm:$0xff]  ;;  %508 = vst.msk [vmem:[#allocation5 + $0x10] sm:$0xff] %vm505_vm0, %v1855_v36 }
  0x81   : > { %509 = vst.msk [vmem:[#allocation5 + $0x18] sm:$0xff] %vm505_vm0, %v1855_v36 }
  0x82   : > { %1240 = vmatmul.msk.bf16.vlgmr.msra.gmra.mxu0 %vm505_vm0, %v1327_v19  ;;  %v1328_v20 = vld [vmem:[#allocation2 + $0x8] sm:$0xff] }
  0x87   : > { %v674_v53 = vld [vmem:[#allocation5 + $0x10] sm:$0xff] }
  0x88   : > { %v675_v54 = vld [vmem:[#allocation5 + $0x18] sm:$0xff] }
  0x92   : > { %1241 = vmatmul.msk.bf16.gmra.mxu0 %vm505_vm0, %v1328_v20 }
  0xff   : > { %v564_v23 = vpop.f32.mrf.mxu0 }
 0x100   : > { %v575_v24 = vadd.f32 %v574_v22, %v564_v23 }
 0x102   : > { %v583_v25 = vsel %vm505_vm0, %v575_v24, -inf }
 0x103   : > { %584 = vmax.xlane.f32.xlu0 %v583_v25  ;;  %v643_v25 = vld [vmem:[#allocation4] sm:$0xff] }
 0x107   : > { %v566_v26 = vpop.f32.mrf.mxu0 }
 0x108   : > { %v576_v27 = vadd.f32 %v574_v22, %v566_v26 }
 0x10a   : > { %v586_v28 = vsel %vm505_vm0, %v576_v27, -inf }
 0x10b   : > { %587 = vmax.xlane.f32.xlu0 %v586_v28 }
 0x10f   : > { %v569_v29 = vpop.f32.mrf.mxu0 }
 0x110   : > { %v2193_v30 = vadd.f32 %v574_v22, %v569_v29 }
 0x112   : > { %v589_v31 = vsel %vm505_vm0, %v2193_v30, -inf }
 0x113   : > { %590 = vmax.xlane.f32.xlu1 %v589_v31 }
 0x117   : > { %v571_v32 = vpop.f32.mrf.mxu0 }
 0x118   : > { %v2197_v33 = vadd.f32 %v574_v22, %v571_v32  ;;  %v673_v32 = vld [vmem:[#allocation5 + $0x8] sm:$0xff] }
 0x11a   : > { %v592_v34 = vsel %vm505_vm0, %v2197_v33, -inf }
 0x11b   : > { %593 = vmax.xlane.f32.xlu1 %v592_v34 }
 0x176   : > { %v585_v38 = vpop.xlane.xlu0 %584 }
 0x177   : > { %v2212_v39 = vmax.f32 %v2209_v37, %v585_v38  ;;  %v645_v38 = vld [vmem:[#allocation4 + $0x10] sm:$0xff] }
 0x179   : > { %v599_v40 = vsub.f32 %v2209_v37, %v2212_v39  ;;  %747 = vst.msk [vmem:[#allocation3] sm:$0xff] %vm496_vm2, %v2212_v39  ;;  %613 = vperm.xlu2 %1512, %v2212_v39  }
 0x17b   : > { %v603_v18 = vmul.f32 1.442695, %v599_v40 }
 0x17e   : > { %v588_v42 = vpop.xlane.xlu0 %587 }
 0x17f   : > { %v596_v43 = vmax.f32 %v580_v41, %v588_v42  ;;  %v646_v42 = vld [vmem:[#allocation4 + $0x18] sm:$0xff] }
 0x181   : > { %v600_v44 = vsub.f32 %v580_v41, %v596_v43  ;;  %748 = vst.msk [vmem:[#allocation3 + $0x8] sm:$0xff] %vm496_vm2, %v596_v43  ;;  %618 = vperm.xlu2 %1512, %v596_v43  }
 0x183   : > { %v605_v4 = vmul.f32 1.442695, %v600_v44 }
 0x186   : > { %v591_v46 = vpop.xlane.xlu1 %590 }
 0x187   : > { %v597_v47 = vmax.f32 %v581_v45, %v591_v46 }
 0x189   : > { %v601_v48 = vsub.f32 %v581_v45, %v597_v47  ;;  %749 = vst.msk [vmem:[#allocation3 + $0x10] sm:$0xff] %vm496_vm2, %v597_v47  ;;  %623 = vperm.xlu0 %1513, %v597_v47  }
 0x18b   : > { %v607_v17 = vmul.f32 1.442695, %v601_v48 }
 0x18e   : > { %v594_v50 = vpop.xlane.xlu1 %593 }
 0x18f   : > { %v598_v51 = vmax.f32 %v582_v49, %v594_v50 }
 0x191   : > { %v602_v52 = vsub.f32 %v582_v49, %v598_v51  ;;  %750 = vst.msk [vmem:[#allocation3 + $0x18] sm:$0xff] %vm496_vm2, %v598_v51  ;;  %628 = vperm.xlu1 %1514, %v598_v51  }
 0x193   : > { %v609_v8 = vmul.f32 1.442695, %v602_v52 }
 0x1d3   : > { %v614_v55 = vpop.permute.xlu2 %613 }
 0x1d4   : > { %v631_v56 = vsub.f32 %v575_v24, %v614_v55 }
 0x1d6   : > { %v635_v57 = vmul.f32 1.442695, %v631_v56 }
 0x1d8   : > { %1515 = vpow2.f32 %v635_v57 }
 0x1db   : > { %v619_v58 = vpop.permute.xlu2 %618 }
 0x1dc   : > { %v632_v59 = vsub.f32 %v576_v27, %v619_v58 }
 0x1de   : > { %v637_v60 = vmul.f32 1.442695, %v632_v59  ;;  %v1516_v61 = vpop.eup %1515 }
 0x1df   : > { %v651_v1 = vsel %vm505_vm0, %v1516_v61, 0.0 }
 0x1e0   : > { %1517 = vpow2.f32 %v637_v60 }
 0x1e6   : > { %v1518_v62 = vpop.eup %1517 }
 0x1e7   : > { %v654_v63 = vsel %vm505_vm0, %v1518_v62, 0.0  ;;  %v700_v0 = vpack.c.bf16 %v1518_v62, %v1516_v61 }
 0x1e8   : > { %655 = vadd.xlane.f32.xlu2 %v654_v63 }
 0x1e9   : > { %1250 = vmatmul.msk.bf16.vlgmr.msra.gmra.mxu1 %vm505_vm0, %v700_v0  ;;  %v672_v0 = vld [vmem:[#allocation5] sm:$0xff] }
 0x1f0   : > { %652 = vadd.xlane.f32.xlu2 %v651_v1 }
 0x1fb   : > { %v624_v2 = vpop.permute.xlu0 %623 }
 0x1fc   : > { %v633_v3 = vsub.f32 %v2193_v30, %v624_v2 }
 0x1fe   : > { %v639_v5 = vmul.f32 1.442695, %v633_v3 }
 0x200   : > { %1519 = vpow2.f32 %v639_v5 }
 0x201   : > { %1521 = vpow2.f32 %v605_v4 }
 0x203   : > { %v629_v6 = vpop.permute.xlu1 %628 }
 0x204   : > { %v634_v7 = vsub.f32 %v2197_v33, %v629_v6 }
 0x206   : > { %v1520_v9 = vpop.eup %1519  ;;  %v641_v10 = vmul.f32 1.442695, %v634_v7 }
 0x207   : > { %v1522_v11 = vpop.eup %1521  ;;  %v657_v12 = vsel %vm505_vm0, %v1520_v9, 0.0 }
 0x208   : > { %1523 = vpow2.f32 %v641_v10  ;;  %683 = vperm.xlu2 %1512, %v1522_v11   ;;  %658 = vadd.xlane.f32.xlu1 %v657_v12  ;;  %v648_v22 = vmul.f32 %v1522_v11, %v644_v21  ;;  %v1341_v21 = vld [vmem:[%s2164_s24 + $0x60] sm:$0xff] }
 0x209   : > { %1525 = vpow2.f32 %v609_v8  ;;  %v1336_v8 = vld [vmem:[%s2164_s24 + $0x38] sm:$0xff] }
 0x20a   : > { %1527 = vpow2.f32 %v607_v17  ;;  %946 = vmatpush.bf16.xpose.msra.mxu2 %v1336_v8  ;;  %v1343_v17 = vld [vmem:[%s2164_s24 + $0x70] sm:$0xff] }
 0x20b   : > { %1529 = vpow2.f32 %v603_v18  ;;  %v1334_v18 = vld [vmem:[%s2164_s24 + $0x28] sm:$0xff] }
 0x20e   : > { %v1524_v13 = vpop.eup %1523 }
 0x20f   : > { %v1526_v14 = vpop.eup %1525  ;;  %v660_v15 = vsel %vm505_vm0, %v1524_v13, 0.0  ;;  %v701_v16 = vpack.c.bf16 %v1524_v13, %v1520_v9  ;;  %v1344_v9 = vld [vmem:[%s2164_s24 + $0x78] sm:$0xff] }
 0x210   : > { %661 = vadd.xlane.f32.xlu0 %v660_v15  ;;  %693 = vperm.xlu2 %1512, %v1526_v14   ;;  %v1528_v19 = vpop.eup %1527  ;;  %v650_v43 = vmul.f32 %v1526_v14, %v646_v42 }
 0x211   : > { %1251 = vmatmul.msk.bf16.gmra.mxu1 %vm505_vm0, %v701_v16  ;;  %v1530_v20 = vpop.eup %1529  ;;  %v649_v39 = vmul.f32 %v1528_v19, %v645_v38  ;;  %959 = vmatpush.bf16.xpose.msra.mxu3 %v1344_v9  ;;  %v1335_v16 = vld [vmem:[%s2164_s24 + $0x30] sm:$0xff] }
 0x212   : > { %v647_v26 = vmul.f32 %v1530_v20, %v643_v25  ;;  %947 = vmatpush.bf16.xpose.msra.mxu2 %v1335_v16  ;;  %v1339_v25 = vld [vmem:[%s2164_s24 + $0x50] sm:$0xff] }
 0x219   : > { %960 = vmatpush.bf16.xpose.msra.mxu3 %v1343_v17 }
 0x21a   : > { %948 = vmatpush.bf16.xpose.msra.mxu2 %v1334_v18 }
 0x221   : > { %688 = vperm.xlu1 %1514, %v1528_v19   ;;  %v1342_v19 = vld [vmem:[%s2164_s24 + $0x68] sm:$0xff] }
 0x222   : > { %961 = vmatpush.bf16.xpose.msra.mxu3 %v1342_v19 }
 0x229   : > { %678 = vperm.xlu1 %1514, %v1530_v20   ;;  %v1333_v20 = vld [vmem:[%s2164_s24 + $0x20] sm:$0xff] }
 0x22a   : > { %949 = vmatpush.bf16.xpose.msra.mxu2 %v1333_v20  ;;  %962 = vmatpush.bf16.xpose.msra.mxu3 %v1341_v21 }
 0x25b   : > { %v656_v23 = vpop.xlane.xlu2 %655 }
 0x25c   : > { %v664_v24 = vadd.f32 %v656_v23, %v648_v22  ;;  %v1332_v22 = vld [vmem:[%s2164_s24 + $0x18] sm:$0xff] }
 0x25d   : > { %v1340_v23 = vld [vmem:[%s2164_s24 + $0x58] sm:$0xff]  ;;  %950 = vmatpush.bf16.xpose.msra.mxu2 %v1332_v22 }
 0x25e   : > { %669 = vst.msk [vmem:[#allocation4 + $0x8] sm:$0xff] %vm496_vm2, %v664_v24  ;;  %963 = vmatpush.bf16.xpose.msra.mxu3 %v1340_v23  ;;  %v1331_v24 = vld [vmem:[%s2164_s24 + $0x10] sm:$0xff] }
 0x263   : > { %v653_v27 = vpop.xlane.xlu2 %652 }
 0x264   : > { %v663_v28 = vadd.f32 %v653_v27, %v647_v26  ;;  %v1330_v26 = vld [vmem:[%s2164_s24 + $0x8] sm:$0xff] }
 0x265   : > { %v755_v29 = vld [vmem:[#allocation4 + $0x8] sm:$0xff]  ;;  %951 = vmatpush.bf16.xpose.msra.mxu2 %v1331_v24 }
 0x266   : > { %668 = vst.msk [vmem:[#allocation4] sm:$0xff] %vm496_vm2, %v663_v28  ;;  %v729_v30 = vpop.f32.mrf.mxu1  ;;  %vm759_vm3 = vcmp.eq.f32.partialorder %v755_v29, 0.0  ;;  %964 = vmatpush.bf16.xpose.msra.mxu3 %v1339_v25  ;;  %v1338_v27 = vld [vmem:[%s2164_s24 + $0x48] sm:$0xff]  ;;  %v1329_v28 = vld [vmem:[%s2164_s24] sm:$0xff] }
 0x267   : > { %v763_v31 = vsel %vm759_vm3, 1.0, %v755_v29  ;;  %v1337_v29 = vld [vmem:[%s2164_s24 + $0x40] sm:$0xff] }
 0x268   : > { %1531 = vrcp.f32 %v763_v31 }
 0x26b   : > { %v684_v33 = vpop.permute.xlu2 %683 }
 0x26c   : > { %v697_v34 = vmul.f32 %v684_v33, %v673_v32 }
 0x26d   : > { %v754_v52 = vld [vmem:[#allocation4] sm:$0xff]  ;;  %952 = vmatpush.bf16.xpose.msra.mxu2 %v1330_v26 }
 0x26e   : > { %v1532_v35 = vpop.eup %1531  ;;  %v731_v36 = vpop.f32.mrf.mxu1  ;;  %vm758_vm6 = vcmp.eq.f32.partialorder %v754_v52, 0.0  ;;  %965 = vmatpush.bf16.xpose.msra.mxu3 %v1338_v27 }
 0x26f   : > { %v740_v37 = vadd.f32 %v731_v36, %v697_v34  ;;  %781 = vperm.xlu2 %1512, %v1532_v35   ;;  %v762_v59 = vsel %vm758_vm6, 1.0, %v754_v52 }
 0x271   : > { %744 = vst.msk [vmem:[#allocation5 + $0x8] sm:$0xff] %vm505_vm0, %v740_v37 }
 0x273   : > { %v694_v55 = vpop.permute.xlu2 %693 }
 0x274   : > { %v699_v58 = vmul.f32 %v694_v55, %v675_v54 }
 0x275   : > { %953 = vmatpush.bf16.xpose.msra.mxu2 %v1329_v28 }
 0x276   : > { %966 = vmatpush.bf16.xpose.msra.mxu3 %v1337_v29 }
 0x278   : > { %v771_v5 = vld [vmem:[#allocation5 + $0x8] sm:$0xff] }
 0x27b   : > { %v659_v40 = vpop.xlane.xlu1 %658 }
 0x27c   : > { %v665_v41 = vadd.f32 %v659_v40, %v649_v39  ;;  %v815_v40 = vld [vmem:[#allocation6] sm:$0xff] }
 0x27e   : > { %670 = vst.msk [vmem:[#allocation4 + $0x10] sm:$0xff] %vm496_vm2, %v665_v41  ;;  %v816_v41 = vld [vmem:[#allocation6 + $0x8] sm:$0xff] }
 0x283   : > { %v662_v44 = vpop.xlane.xlu0 %661 }
 0x284   : > { %v666_v45 = vadd.f32 %v662_v44, %v650_v43 }
 0x285   : > { %v756_v46 = vld [vmem:[#allocation4 + $0x10] sm:$0xff] }
 0x286   : > { %671 = vst.msk [vmem:[#allocation4 + $0x18] sm:$0xff] %vm496_vm2, %v666_v45  ;;  %vm760_vm4 = vcmp.eq.f32.partialorder %v756_v46, 0.0 }
 0x287   : > { %v764_v47 = vsel %vm760_vm4, 1.0, %v756_v46 }
 0x288   : > { %1533 = vrcp.f32 %v764_v47 }
 0x28d   : > { %v757_v48 = vld [vmem:[#allocation4 + $0x18] sm:$0xff] }
 0x28e   : > { %v1534_v49 = vpop.eup %1533  ;;  %v734_v50 = vpop.f32.mrf.mxu1  ;;  %vm761_vm5 = vcmp.eq.f32.partialorder %v757_v48, 0.0 }
 0x28f   : > { %786 = vperm.xlu0 %1513, %v1534_v49   ;;  %v765_v51 = vsel %vm761_vm5, 1.0, %v757_v48 }
 0x290   : > { %1535 = vrcp.f32 %v765_v51 }
 0x291   : > { %1537 = vrcp.f32 %v762_v59 }
 0x293   : > { %v689_v56 = vpop.permute.xlu1 %688 }
 0x294   : > { %v698_v57 = vmul.f32 %v689_v56, %v674_v53 }
 0x296   : > { %v1536_v60 = vpop.eup %1535  ;;  %v741_v61 = vadd.f32 %v734_v50, %v698_v57  ;;  %v736_v62 = vpop.f32.mrf.mxu1 }
 0x297   : > { %v742_v63 = vadd.f32 %v736_v62, %v699_v58  ;;  %791 = vperm.xlu2 %1512, %v1536_v60   ;;  %v1538_v3 = vpop.eup %1537 }
 0x298   : > { %745 = vst.msk [vmem:[#allocation5 + $0x10] sm:$0xff] %vm505_vm0, %v741_v61 }
 0x299   : > { %746 = vst.msk [vmem:[#allocation5 + $0x18] sm:$0xff] %vm505_vm0, %v742_v63 }
 0x29b   : > { %v679_v1 = vpop.permute.xlu1 %678 }
 0x29c   : > { %v696_v2 = vmul.f32 %v679_v1, %v672_v0 }
 0x29e   : > { %v739_v4 = vadd.f32 %v729_v30, %v696_v2 }
 0x29f   : > { %776 = vperm.xlu2 %1512, %v1538_v3   ;;  %v772_v14 = vld [vmem:[#allocation5 + $0x10] sm:$0xff] }
 0x2a0   : > { %743 = vst.msk [vmem:[#allocation5] sm:$0xff] %vm505_vm0, %v739_v4  ;;  %v773_v10 = vld [vmem:[#allocation5 + $0x18] sm:$0xff] }
 0x2a7   : > { %v770_v31 = vld [vmem:[#allocation5] sm:$0xff] }
 0x2c9   : > { %v782_v6 = vpop.permute.xlu2 %781 }
 0x2ca   : > { %v795_v7 = vmul.f32 %v782_v6, %v771_v5 }
 0x2cc   : > { %799 = vrot.lane.b32.xlu1 %v795_v7, %s1856_s3 }
 0x2f1   : > { %v792_v11 = vpop.permute.xlu2 %791 }
 0x2f2   : > { %v797_v12 = vmul.f32 %v792_v11, %v773_v10 }
 0x2f4   : > { %807 = vrot.lane.b32.xlu2 %v797_v12, %s1857_s28 }
 0x2f9   : > { %v777_v30 = vpop.permute.xlu2 %776 }
 0x2fa   : > { %v794_v33 = vmul.f32 %v777_v30, %v770_v31 }
 0x301   : > { %v787_v13 = vpop.permute.xlu0 %786 }
 0x302   : > { %v796_v15 = vmul.f32 %v787_v13, %v772_v14 }
 0x304   : > { %803 = vrot.lane.b32.xlu0 %v796_v15, %s1858_s7 }
 0x33e   : > { %v800_v32 = vpop.permute.xlu1 %799 }
 0x33f   : > { %v810_v34 = vsel %vm505_vm0, %v794_v33, %v800_v32 }
 0x34e   : > { %v808_v36 = vpop.permute.xlu2 %807 }
 0x376   : > { %v804_v35 = vpop.permute.xlu0 %803 }
 0x377   : > { %v812_v37 = vsel %vm811_vm7, %v810_v34, %v804_v35 }
 0x378   : > { %v814_v38 = vsel %vm813_vm8, %v812_v37, %v808_v36 }
 0x379   : > { %v817_v39 = vpack.c.bf16 %v814_v38, %v814_v38 }
 0x37b   : > { %954 = vmatmul.bf16.vlgmr.msra.gmra.mxu2 %v817_v39  ;;  %967 = vmatmul.bf16.vlgmr.msra.gmra.mxu3 %v817_v39 }
 0x3fe   : > { %v955_v42 = vpop.f32.mrf.mxu2  ;;  %v968_v43 = vpop.f32.mrf.mxu3 }
 0x3ff   : > { %v972_v44 = vadd.f32 %v955_v42, %v815_v40  ;;  %v973_v45 = vadd.f32 %v968_v43, %v816_v41 }
 0x401   : > { %974 = vst [vmem:[#allocation6] sm:$0xff] %v972_v44 }
 0x402   : > { %975 = vst [vmem:[#allocation6 + $0x8] sm:$0xff] %v973_v45  ;;  %980 = sbr.rel (!%p976_p6) target bundleno = 1035 (0x40b), region = 76 }
 0x406   : > { %v957_v46 = vpop.f32.mrf.mxu2  ;;  %v970_v47 = vpop.f32.mrf.mxu3 }
 0x408   : > { %v981_v48 = vld [vmem:[#allocation6] sm:$0xff] }
 0x409   : > { %v982_v49 = vld [vmem:[#allocation6 + $0x8] sm:$0xff]  ;;  %983 = vst [vmem:[%s2172_s13] sm:$0xff] %v981_v48 }
 0x40a   : > { %984 = vst [vmem:[%s2172_s13 + $0x8] sm:$0xff] %v982_v49 }
 0x40b PF: > { %s2406_s30 = sld [smem:[#allocation25_spill]]  ;;  %s1001_s18 = sshll.u32 %s2172_s13, 4  ;;  %s1002_s18 = int_to_ptr.vmem [resolvable:$true] %s1001_s18 }
 0x40c   : > { %s2407_s14 = sld [smem:[#allocation40_spill]]  ;;  %s986_s2 = scalar_lea.sflag [#allocation9], %s2153_s21 }
 0x411   : > { %s1346_s9 = sshll.u32 %s2406_s30, 4 }
 0x412   : > { %s999_s1 = scalar_lea.hbm %s2407_s14, %s1346_s9  ;;  %s1709_s27 = scalar_lea.hbm %s2407_s14, 32 }
 0x413   : > { %s1003_s12 = sshll.u32 %s999_s1, 4  ;;  %s1004_s12 = int_to_ptr.hbm [resolvable:$true] %s1003_s12 }
 0x414   : > { %s1703_s17 = sshra.s32 %s1004_s12, 4  ;;  %s1704_s17 = int_to_ptr.hbm [resolvable:$true] %s1703_s17 }
 0x415   : > { %s1705_s4 = scalar_lea.hbm %s1704_s17, 16  ;;  %p1710_p13 = scmp.lt.s32.totalorder %s1704_s17, %s2407_s14 }
 0x416   : > { %p1706_p12 = scmp.ne.s32.totalorder %s1704_s17, %s1705_s4  ;;  %p1711_p1 = scmp.lt.s32.totalorder %s1709_s27, %s1705_s4 }
 0x418   : > { %p1707_p3 = pnand %p1706_p12, %p2072_p0  ;;  %p1712_p4 = por %p1711_p1, %p1710_p13 }
 0x41a   : > { %p1708_p9 = pneg %p1707_p3 }
 0x41c   : > { %p1713_p7 = pnand %p1712_p4, %p1708_p9 }
 0x41e   : > { %1716 = shalt.err (!%p1713_p7)
}
 0x41f   : > { %1366 = dma.vmem_to_hbm [thread:$0]  (%p2072_p0), %s1002_s18, 256, %s1004_s12, %s986_s2  }
 0x420 PF: > { %s2408_s21 = sld [smem:[#allocation22_spill]]  ;;  %p1389_p11 = scmp.ge.s32.totalorder %s1847_s6, 2 }
 0x422   : > { %p1385_p5 = pnand %p1389_p11, %p2076_p2 }
 0x424   : > { %p1386_p10 = pneg %p1385_p5 }
 0x426   : > { %s1015_s13 = sand.u32 1, %s2408_s21  }
 0x427   : > { %s1016_s3 = scalar_lea.sflag [#allocation9], %s1015_s13 }
 0x428   : > { %1790 = dma.done.wait (%p1386_p10), %s1016_s3, 256  }
 0x429   : > { %1792 = vsyncadd (%p1386_p10), %s1016_s3, 4294967040  ;;  %s27_s6 = sadd.s32 1, %s1847_s6   ;;  %s2411_s15 = sld [smem:[#allocation23_spill]] }
 0x42a   : > { %p2286_p8 = scmp.ge.s32.totalorder %s27_s6, 6   ;;  %s2412_s23 = sld [smem:[#allocation31_spill]] }
 0x42b   : > { %s2413_s7 = sld [smem:[#allocation30_spill]]  ;;  %s2419_s18 = smov %s1799_s19 }
 0x42c   : > { %s2414_s27 = sld [smem:[#allocation26_spill]]  ;;  %s2420_s19 = smov %s1803_s20 }
 0x42d   : > { %s2415_s0 = sld [smem:[#allocation27_spill]]  ;;  %s2421_s20 = smov %s2126_s29 }
 0x42e   : > { %s2416_s30 = sld [smem:[#allocation28_spill]]  ;;  %s2422_s21 = smov %s1811_s22 }
 0x42f   : > { %s2417_s9 = sld [smem:[#allocation29_spill]]  ;;  %s2423_s22 = smov %s2411_s15 }
 0x430   : > { %s2424_s24 = smov %s1823_s25  ;;  %s2425_s25 = smov %s1827_s26 }
 0x431   : > { %s2426_s26 = smov %s2413_s7  ;;  %26 = sbr.rel (!%p2286_p8) target bundleno = 21 (0x15), region = 149 }
 0x433   : > { %s2427_s28 = smov %s2415_s0 }
 0x434   : > { %s2428_s29 = smov %s2416_s30 }
 0x435   : > { %s2429_s30 = smov %s2417_s9 }
 0x436   :  { %1022 = vsyncpa [#allocation8], 1 }
 0x437   :  { %1024 = vsyncpa [#allocation8 + $0x1], 1 }
 0x438   :  { %1025 = vsyncpa [#allocation11], 1 }
 0x439   :  { %1027 = vsyncpa [#allocation11 + $0x1], 1 }
 0x43a   :  { %1028 = vsyncpa [#allocation14], 1 }
 0x43b   :  { %1030 = vsyncpa [#allocation14 + $0x1], 1 }
 0x43c   :  { %1031 = vsyncpa [#allocation9], 1 }
 0x43d   :  { %1033 = vsyncpa [#allocation9 + $0x1], 1 }

</bundles_post_ra>
